<compile_context>
chip_gen: v7x
topology: tpu7x:2x2x1
jax: 0.10.0
libtpu: 0.0.40
codegen_flags: <defaults>
</compile_context>

<pallas_src>
import functools
import math

import jax
import jax.numpy as jnp
from jax import lax
from jax.experimental import pallas as pl
from jax.experimental.pallas import tpu as pltpu

NEG_INF = -1e32   # matches the reference masked_fill_(-1e+32)


def _layer_norm(x, g, b, eps=1e-5):
    mu = jnp.mean(x, axis=-1, keepdims=True)
    var = jnp.mean((x - mu) ** 2, axis=-1, keepdims=True)
    return (x - mu) * lax.rsqrt(var + eps) * g + b


def make_mha_kernel(b_tile, seq_len, d_head, d_model, compute_dtype):
    T = seq_len
    rows = b_tile * T
    scale = 1.0 / math.sqrt(d_head)

    def kernel(xq_ref, xk_ref, xv_ref, mask_ref,
               wk_ref, bk_ref, wq_ref, bq_ref, wv_ref, bv_ref,
               wo_ref, bo_ref, g1_ref, be1_ref,
               w1_ref, b1_ref, w2_ref, b2_ref, g2_ref, be2_ref,
               out_ref, acc_ref, bias_ref):
        h = pl.program_id(1)

        # --- once per batch tile (first head): zero the out_proj accumulator
        # and build the additive attention bias (key padding OR the
        # no-self-attention diagonal -> -1e32, else 0), shared by all heads.
        @pl.when(h == 0)
        def _():
            acc_ref[...] = jnp.zeros_like(acc_ref)
            key_pad = mask_ref[...][:, 0, :] == 0.0                   # (b_tile, T)
            row_i = lax.broadcasted_iota(jnp.int32, (T, T), 0)
            col_i = lax.broadcasted_iota(jnp.int32, (T, T), 1)
            diag = row_i == col_i                                     # (T, T)
            bias_ref[...] = jnp.where(key_pad[:, None, :] | diag[None, :, :],
                                      NEG_INF, 0.0)

        xq = xq_ref[...].reshape(rows, -1)     # (rows, d_key), pos.emb. pre-added
        xk = xk_ref[...].reshape(rows, -1)     # (rows, d_key), pos.emb. pre-added
        xv = xv_ref[...].reshape(rows, -1)     # (rows, d_val)

        # Per-head projections.  The per-head weight slab arrives via the
        # BlockSpec index_map, so there is no in-kernel head splitting.
        # NOTE: the reference forward projects k from qq and q from kk (it is
        # written that way in the PyTorch module) -- kept on purpose.
        k = jnp.dot(xq, wk_ref[0], preferred_element_type=jnp.float32) + bk_ref[0]
        q = jnp.dot(xk, wq_ref[0], preferred_element_type=jnp.float32) + bq_ref[0]
        v = jnp.dot(xv, wv_ref[0], preferred_element_type=jnp.float32) + bv_ref[0]
        q = q * scale                          # fold 1/sqrt(d_head) into q once

        # (rows, d_head) -> (b_tile, T, d_head): outer-dim split only (free).
        qg = q.reshape(b_tile, T, d_head).astype(compute_dtype)
        kg = k.reshape(b_tile, T, d_head).astype(compute_dtype)
        vg = v.reshape(b_tile, T, d_head).astype(compute_dtype)

        # Batched attention over the batch tile (leading-batch einsums only).
        s = jnp.einsum('bqd,bkd->bqk', qg, kg,
                       preferred_element_type=jnp.float32)            # (b_tile,T,T)
        s = s + bias_ref[...]
        s = s - jnp.max(s, axis=-1, keepdims=True)
        p = jnp.exp(s)
        p = p / jnp.sum(p, axis=-1, keepdims=True)   # exact divide (torch parity)
        og = jnp.einsum('bqk,bkd->bqd', p.astype(compute_dtype), vg,
                        preferred_element_type=jnp.float32)           # (b_tile,T,dh)

        # out_proj(concat_h) == sum_h attn_h @ Wo[h]: accumulate per head, so
        # the head-merge concat never has to be materialized.
        acc_ref[...] += jnp.dot(og.reshape(rows, d_head).astype(compute_dtype),
                                wo_ref[0], preferred_element_type=jnp.float32)

        # --- last head: out_proj bias + LayerNorm + FFN + LayerNorm + residual.
        @pl.when(h == pl.num_programs(1) - 1)
        def _():
            # TODO(synk): nn.Dropout omitted (inference / eval semantics -> identity).
            proj = acc_ref[...] + bo_ref[...]
            out = _layer_norm(proj, g1_ref[...], be1_ref[...])
            h1 = jnp.maximum(
                jnp.dot(out.astype(compute_dtype), w1_ref[...],
                        preferred_element_type=jnp.float32) + b1_ref[...], 0.0)
            o1 = jnp.dot(h1.astype(compute_dtype), w2_ref[...],
                         preferred_element_type=jnp.float32) + b2_ref[...]
            out = out + _layer_norm(o1, g2_ref[...], be2_ref[...])
            out_ref[...] = out.reshape(b_tile, T, d_model).astype(out_ref.dtype)

    return kernel


def _vmem_budget_bytes():
    """Generation-aware VMEM budget (128 MiB/core on v5e/v6e, 64 MiB on v7x)."""
    cap = 64 * 1024 * 1024
    try:
        info = pltpu.get_tpu_info()
        cap = int(getattr(info, "vmem_capacity_bytes", cap))
    except Exception:
        pass
    return int(min(cap - 8 * 1024 * 1024, 0.85 * cap))


def _pick_b_tile(B, T, d_key, d_val, d_model, d_head, bpe_in, bpe_out, budget):
    """Largest batch tile fitting the VMEM budget while keeping >=2 (ideally
    >=4, and even) steps on the parallel axis for megacore + DMA overlap."""
    w_bytes = (2 * d_key + d_val + 3 * d_model) * d_model * bpe_in + 32 * d_model * 4

    def fits(bt):
        rows = bt * T
        act_in = 2 * rows * (2 * d_key + d_val) * bpe_in      # double-buffered inputs
        out_b = 2 * rows * d_model * bpe_out                  # double-buffered output
        scratch = rows * d_model * 4 + bt * T * T * 4         # acc + bias scratch
        work = 3 * bt * T * T * 4 + 9 * rows * d_head * 4 + 4 * rows * d_model * 4
        return w_bytes + act_in + out_b + scratch + work <= budget

    divisors = [d for d in range(1, B + 1) if B % d == 0]
    cands = []
    for min_steps in (4, 2, 1):
        cands = [d for d in divisors if B // d >= min_steps and fits(d)]
        if cands:
            break
    if not cands:
        cands = [1]
    even = [d for d in cands if (B // d) % 2 == 0]
    return max(even) if even else max(cands)


def init_params(key, d_key, d_val, d_model):
    """Deterministic synthetic parameters matching the module's _reset_parameters."""
    ks = jax.random.split(key, 6)

    def xavier(k, out_f, in_f):
        bound = math.sqrt(6.0 / (in_f + out_f))
        return jax.random.uniform(k, (out_f, in_f), jnp.float32, -bound, bound)

    def default_linear(k, out_f, in_f):
        kw, kb = jax.random.split(k)
        bound = 1.0 / math.sqrt(in_f)
        w = jax.random.uniform(kw, (out_f, in_f), jnp.float32, -bound, bound)
        b = jax.random.uniform(kb, (out_f,), jnp.float32, -bound, bound)
        return w, b

    wk = xavier(ks[0], d_model, d_key)
    wq = xavier(ks[1], d_model, d_key)
    wv = xavier(ks[2], d_model, d_val)
    wo, _ = default_linear(ks[3], d_model, d_model)    # out_proj bias is zeroed
    w1, b1 = default_linear(ks[4], d_model, d_model)
    w2, b2 = default_linear(ks[5], d_model, d_model)
    zeros = jnp.zeros((d_model,), jnp.float32)
    ones = jnp.ones((d_model,), jnp.float32)
    return dict(wk=wk, bk=zeros, wq=wq, bq=zeros, wv=wv, bv=zeros,
                wo=wo, bo=zeros, w1=w1, b1=b1, w2=w2, b2=b2,
                g1=ones, be1=zeros, g2=ones, be2=zeros)


@functools.partial(jax.jit,
                   static_argnames=("n_heads", "b_tile", "compute_dtype", "out_dtype"))
def multi_head_attention_forward(qq, kk, vv, mask, params, n_heads,
                                 b_tile=None, compute_dtype=jnp.bfloat16,
                                 out_dtype=jnp.float32):
    T, B, d_key = qq.shape
    d_val = vv.shape[-1]
    d_model = params["wq"].shape[0]
    assert d_model % n_heads == 0
    d_head = d_model // n_heads

    # CosinePositionalEmbedding (interleaved sin/cos) / sqrt(d_model), exactly
    # as in the reference forward.  Pre-added here; XLA fuses it with the
    # batch-major transpose + bf16 cast into a single pass per input.
    position = jnp.arange(T, dtype=jnp.float32)[:, None]
    div_term = jnp.exp(jnp.arange(0, d_key, 2, dtype=jnp.float32)
                       * (-math.log(10000.0) / d_key))
    pe = jnp.stack([jnp.sin(position * div_term),
                    jnp.cos(position * div_term)], axis=-1).reshape(T, d_key)
    pe = pe / math.sqrt(d_model)

    # TODO(synk): keeping (T, B, d) inputs plus an in-kernel (t,b)->(b,t)
    # regroup would save this (fused) transpose pass; skipped for lowering safety.
    xq = (jnp.transpose(qq, (1, 0, 2)) + pe[None]).astype(compute_dtype)   # (B,T,dk)
    xk = (jnp.transpose(kk, (1, 0, 2)) + pe[None]).astype(compute_dtype)   # (B,T,dk)
    xv = jnp.transpose(vv, (1, 0, 2)).astype(compute_dtype)                # (B,T,dv)
    m = jnp.transpose(mask, (1, 0)).astype(jnp.float32)[:, None, :]        # (B,1,T)

    # Per-head weight stacks (head selection happens via the BlockSpec
    # index_map -> zero in-kernel head splitting / lane slicing).
    def head_stack_in(w):      # (d_model, d_in) -> (n_heads, d_in, d_head)
        return jnp.transpose(w.T.reshape(-1, n_heads, d_head),
                             (1, 0, 2)).astype(compute_dtype)

    def head_stack_bias(b):    # (d_model,) -> (n_heads, 1, d_head)
        return b.reshape(n_heads, 1, d_head).astype(jnp.float32)

    wk_h = head_stack_in(params["wk"]); bk_h = head_stack_bias(params["bk"])
    wq_h = head_stack_in(params["wq"]); bq_h = head_stack_bias(params["bq"])
    wv_h = head_stack_in(params["wv"]); bv_h = head_stack_bias(params["bv"])
    wo_h = params["wo"].T.reshape(n_heads, d_head, d_model).astype(compute_dtype)

    wT = lambda name: params[name].T.astype(compute_dtype)
    vec = lambda name: params[name].reshape(1, -1).astype(jnp.float32)

    bpe_in = jnp.dtype(compute_dtype).itemsize
    bpe_out = jnp.dtype(out_dtype).itemsize
    budget = _vmem_budget_bytes()
    if b_tile is None:
        b_tile = _pick_b_tile(B, T, d_key, d_val, d_model, d_head,
                              bpe_in, bpe_out, budget)
    assert B % b_tile == 0
    n_b_tiles = B // b_tile

    act = lambda d: pl.BlockSpec((b_tile, T, d), lambda b, h: (b, 0, 0))
    per_head = lambda shape: pl.BlockSpec((1,) + shape, lambda b, h: (h, 0, 0))
    full = lambda shape: pl.BlockSpec(shape, lambda b, h: (0,) * len(shape))

    in_specs = [
        act(d_key),                                             # qq + pe -> k_linear in
        act(d_key),                                             # kk + pe -> q_linear in
        act(d_val),                                             # vv      -> v_linear in
        pl.BlockSpec((b_tile, 1, T), lambda b, h: (b, 0, 0)),   # key-padding mask
        per_head((d_key, d_head)), per_head((1, d_head)),       # k_linear w, b (per head)
        per_head((d_key, d_head)), per_head((1, d_head)),       # q_linear w, b (per head)
        per_head((d_val, d_head)), per_head((1, d_head)),       # v_linear w, b (per head)
        per_head((d_head, d_model)), full((1, d_model)),        # out_proj w (per head), b
        full((1, d_model)), full((1, d_model)),                 # layer_norm1 g, b
        full((d_model, d_model)), full((1, d_model)),           # linear1 w, b
        full((d_model, d_model)), full((1, d_model)),           # linear2 w, b
        full((1, d_model)), full((1, d_model)),                 # layer_norm2 g, b
    ]

    out = pl.pallas_call(
        make_mha_kernel(b_tile, T, d_head, d_model, compute_dtype),
        out_shape=jax.ShapeDtypeStruct((B, T, d_model), out_dtype),
        grid=(n_b_tiles, n_heads),
        in_specs=in_specs,
        out_specs=pl.BlockSpec((b_tile, T, d_model), lambda b, h: (b, 0, 0)),
        scratch_shapes=[pltpu.VMEM((b_tile * T, d_model), jnp.float32),   # out_proj acc
                        pltpu.VMEM((b_tile, T, T), jnp.float32)],         # attn bias
        compiler_params=pltpu.CompilerParams(
            dimension_semantics=("parallel", "arbitrary"),
            vmem_limit_bytes=max(32 * 1024 * 1024, budget)),
    )(xq, xk, xv, m,
      wk_h, bk_h, wq_h, bq_h, wv_h, bv_h,
      wo_h, vec("bo"), vec("g1"), vec("be1"),
      wT("w1"), vec("b1"), wT("w2"), vec("b2"), vec("g2"), vec("be2"))

    return jnp.transpose(out, (1, 0, 2))   # (T, B, d_model)


if __name__ == "__main__":
    T, B = 8, 2
    d_key = d_val = d_model = 32
    n_heads = 4

    key = jax.random.PRNGKey(0)
    k1, k2, k3, kp = jax.random.split(key, 4)
    qq = jax.random.normal(k1, (T, B, d_key), dtype=jnp.float32)
    kk = jax.random.normal(k2, (T, B, d_key), dtype=jnp.float32)
    vv = jax.random.normal(k3, (T, B, d_val), dtype=jnp.float32)
    # (T, B) padding mask: 1 = keep, 0 = masked key position
    mask = jnp.ones((T, B), dtype=jnp.float32).at[T - 1, 1].set(0.0)

    params = init_params(kp, d_key, d_val, d_model)

    out = multi_head_attention_forward(qq, kk, vv, mask, params, n_heads=n_heads)
    jax.block_until_ready(out)
    assert out.shape == (T, B, d_model)
    print("KERNEL_OK")
</pallas_src>

<mosaic_0001>
module attributes {stable_mosaic.version = 11 : i64} {
  func.func @kernel(%arg0: i32, %arg1: i32, %arg2: memref<1x8x32xbf16, #tpu.memory_space<vmem>>, %arg3: memref<1x8x32xbf16, #tpu.memory_space<vmem>>, %arg4: memref<1x8x32xbf16, #tpu.memory_space<vmem>>, %arg5: memref<1x1x8xf32, #tpu.memory_space<vmem>>, %arg6: memref<1x32x8xbf16, #tpu.memory_space<vmem>>, %arg7: memref<1x1x8xf32, #tpu.memory_space<vmem>>, %arg8: memref<1x32x8xbf16, #tpu.memory_space<vmem>>, %arg9: memref<1x1x8xf32, #tpu.memory_space<vmem>>, %arg10: memref<1x32x8xbf16, #tpu.memory_space<vmem>>, %arg11: memref<1x1x8xf32, #tpu.memory_space<vmem>>, %arg12: memref<1x8x32xbf16, #tpu.memory_space<vmem>>, %arg13: memref<1x32xf32, #tpu.memory_space<vmem>>, %arg14: memref<1x32xf32, #tpu.memory_space<vmem>>, %arg15: memref<1x32xf32, #tpu.memory_space<vmem>>, %arg16: memref<32x32xbf16, #tpu.memory_space<vmem>>, %arg17: memref<1x32xf32, #tpu.memory_space<vmem>>, %arg18: memref<32x32xbf16, #tpu.memory_space<vmem>>, %arg19: memref<1x32xf32, #tpu.memory_space<vmem>>, %arg20: memref<1x32xf32, #tpu.memory_space<vmem>>, %arg21: memref<1x32xf32, #tpu.memory_space<vmem>>, %arg22: memref<1x8x32xf32, #tpu.memory_space<vmem>>, %arg23: memref<8x32xf32, #tpu.memory_space<vmem>>, %arg24: memref<1x8x8xf32, #tpu.memory_space<vmem>>) attributes {dimension_semantics = [#tpu.dimension_semantics<parallel>, #tpu.dimension_semantics<arbitrary>], iteration_bounds = array<i64: 2, 4>, scalar_prefetch = 0 : i64, scratch_operands = 2 : i64, tpu.core_type = #tpu.core_type<tc>, window_params = [{transform_indices = @transform_0, window_bounds = array<i64: 1, 8, 32>}, {transform_indices = @transform_1, window_bounds = array<i64: 1, 8, 32>}, {transform_indices = @transform_2, window_bounds = array<i64: 1, 8, 32>}, {transform_indices = @transform_3, window_bounds = array<i64: 1, 1, 8>}, {transform_indices = @transform_4, window_bounds = array<i64: 1, 32, 8>}, {transform_indices = @transform_5, window_bounds = array<i64: 1, 1, 8>}, {transform_indices = @transform_6, window_bounds = array<i64: 1, 32, 8>}, {transform_indices = @transform_7, window_bounds = array<i64: 1, 1, 8>}, {transform_indices = @transform_8, window_bounds = array<i64: 1, 32, 8>}, {transform_indices = @transform_9, window_bounds = array<i64: 1, 1, 8>}, {transform_indices = @transform_10, window_bounds = array<i64: 1, 8, 32>}, {pipeline_mode = #tpu.pipeline_mode<synchronous>, transform_indices = @transform_11, window_bounds = array<i64: 1, 32>}, {pipeline_mode = #tpu.pipeline_mode<synchronous>, transform_indices = @transform_12, window_bounds = array<i64: 1, 32>}, {pipeline_mode = #tpu.pipeline_mode<synchronous>, transform_indices = @transform_13, window_bounds = array<i64: 1, 32>}, {pipeline_mode = #tpu.pipeline_mode<synchronous>, transform_indices = @transform_14, window_bounds = array<i64: 32, 32>}, {pipeline_mode = #tpu.pipeline_mode<synchronous>, transform_indices = @transform_15, window_bounds = array<i64: 1, 32>}, {pipeline_mode = #tpu.pipeline_mode<synchronous>, transform_indices = @transform_16, window_bounds = array<i64: 32, 32>}, {pipeline_mode = #tpu.pipeline_mode<synchronous>, transform_indices = @transform_17, window_bounds = array<i64: 1, 32>}, {pipeline_mode = #tpu.pipeline_mode<synchronous>, transform_indices = @transform_18, window_bounds = array<i64: 1, 32>}, {pipeline_mode = #tpu.pipeline_mode<synchronous>, transform_indices = @transform_19, window_bounds = array<i64: 1, 32>}, {transform_indices = @transform_20, window_bounds = array<i64: 1, 8, 32>}]} {
    %c0_i32 = arith.constant 0 : i32
    %0 = arith.cmpi eq, %arg1, %c0_i32 : i32
    %1 = arith.extui %0 : i1 to i32
    %c0_i32_0 = arith.constant 0 : i32
    %2 = arith.cmpi ne, %1, %c0_i32_0 : i32
    scf.if %2 {
      %cst_46 = arith.constant 0.000000e+00 : f32
      %63 = vector.broadcast %cst_46 : f32 to vector<8x32xf32>
      %c0_47 = arith.constant 0 : index
      %c0_48 = arith.constant 0 : index
      %64 = vector.load %arg23[%c0_47, %c0_48] : memref<8x32xf32, #tpu.memory_space<vmem>>, vector<8x32xf32>
      tpu.vector_store %arg23[%c0_47, %c0_48], %63 {strides = array<i32>} : memref<8x32xf32, #tpu.memory_space<vmem>>, vector<8x32xf32>,
      %c0_49 = arith.constant 0 : index
      %c0_50 = arith.constant 0 : index
      %c0_51 = arith.constant 0 : index
      %65 = vector.load %arg5[%c0_49, %c0_50, %c0_51] : memref<1x1x8xf32, #tpu.memory_space<vmem>>, vector<1x1x8xf32>
      %66 = vector.shape_cast %65 : vector<1x1x8xf32> to vector<1x8xf32>
      %cst_52 = arith.constant 0.000000e+00 : f32
      %67 = vector.broadcast %cst_52 : f32 to vector<1x8xf32>
      %68 = arith.cmpf oeq, %66, %67 : vector<1x8xf32>
      %69 = tpu.iota {dimensions = array<i32: 0>} : vector<8x8xi32>
      %70 = tpu.iota {dimensions = array<i32: 1>} : vector<8x8xi32>
      %71 = arith.cmpi eq, %69, %70 : vector<8x8xi32>
      %72 = vector.shape_cast %68 : vector<1x8xi1> to vector<1x1x8xi1>
      %73 = vector.shape_cast %71 : vector<8x8xi1> to vector<1x8x8xi1>
      %74 = vector.broadcast %72 : vector<1x1x8xi1> to vector<1x8x8xi1>
      %75 = arith.ori %74, %73 : vector<1x8x8xi1>
      %cst_53 = arith.constant -1.000000e+32 : f32
      %cst_54 = arith.constant 0.000000e+00 : f32
      %76 = vector.broadcast %cst_53 : f32 to vector<1x8x8xf32>
      %77 = vector.broadcast %cst_54 : f32 to vector<1x8x8xf32>
      %78 = arith.select %75, %76, %77 : vector<1x8x8xi1>, vector<1x8x8xf32>
      %c0_55 = arith.constant 0 : index
      %c0_56 = arith.constant 0 : index
      %c0_57 = arith.constant 0 : index
      %79 = vector.load %arg24[%c0_55, %c0_56, %c0_57] : memref<1x8x8xf32, #tpu.memory_space<vmem>>, vector<1x8x8xf32>
      tpu.vector_store %arg24[%c0_55, %c0_56, %c0_57], %78 {strides = array<i32>} : memref<1x8x8xf32, #tpu.memory_space<vmem>>, vector<1x8x8xf32>,
    } else {
    }
    %c0 = arith.constant 0 : index
    %c0_1 = arith.constant 0 : index
    %c0_2 = arith.constant 0 : index
    %3 = vector.load %arg2[%c0, %c0_1, %c0_2] : memref<1x8x32xbf16, #tpu.memory_space<vmem>>, vector<1x8x32xbf16>
    %4 = vector.shape_cast %3 : vector<1x8x32xbf16> to vector<8x32xbf16>
    %c0_3 = arith.constant 0 : index
    %c0_4 = arith.constant 0 : index
    %c0_5 = arith.constant 0 : index
    %5 = vector.load %arg3[%c0_3, %c0_4, %c0_5] : memref<1x8x32xbf16, #tpu.memory_space<vmem>>, vector<1x8x32xbf16>
    %6 = vector.shape_cast %5 : vector<1x8x32xbf16> to vector<8x32xbf16>
    %c0_6 = arith.constant 0 : index
    %c0_7 = arith.constant 0 : index
    %c0_8 = arith.constant 0 : index
    %7 = vector.load %arg4[%c0_6, %c0_7, %c0_8] : memref<1x8x32xbf16, #tpu.memory_space<vmem>>, vector<1x8x32xbf16>
    %8 = vector.shape_cast %7 : vector<1x8x32xbf16> to vector<8x32xbf16>
    %c0_9 = arith.constant 0 : index
    %c0_10 = arith.constant 0 : index
    %c0_11 = arith.constant 0 : index
    %9 = vector.load %arg6[%c0_9, %c0_10, %c0_11] : memref<1x32x8xbf16, #tpu.memory_space<vmem>>, vector<1x32x8xbf16>
    %10 = vector.shape_cast %9 : vector<1x32x8xbf16> to vector<32x8xbf16>
    %cst = arith.constant dense<0.000000e+00> : vector<8x8xf32>
    %11 = tpu.matmul %4, %10, %cst {dimension_numbers = #tpu.dot_dimension_numbers<[1], [0], [0], [1], [0, 0, 1, 1], [], []>} : vector<8x32xbf16>, vector<32x8xbf16>, vector<8x8xf32> -> vector<8x8xf32>
    %c0_12 = arith.constant 0 : index
    %c0_13 = arith.constant 0 : index
    %c0_14 = arith.constant 0 : index
    %12 = vector.load %arg7[%c0_12, %c0_13, %c0_14] : memref<1x1x8xf32, #tpu.memory_space<vmem>>, vector<1x1x8xf32>
    %13 = vector.shape_cast %12 : vector<1x1x8xf32> to vector<1x8xf32>
    %14 = vector.broadcast %13 : vector<1x8xf32> to vector<8x8xf32>
    %15 = arith.addf %11, %14 : vector<8x8xf32>
    %c0_15 = arith.constant 0 : index
    %c0_16 = arith.constant 0 : index
    %c0_17 = arith.constant 0 : index
    %16 = vector.load %arg8[%c0_15, %c0_16, %c0_17] : memref<1x32x8xbf16, #tpu.memory_space<vmem>>, vector<1x32x8xbf16>
    %17 = vector.shape_cast %16 : vector<1x32x8xbf16> to vector<32x8xbf16>
    %cst_18 = arith.constant dense<0.000000e+00> : vector<8x8xf32>
    %18 = tpu.matmul %6, %17, %cst_18 {dimension_numbers = #tpu.dot_dimension_numbers<[1], [0], [0], [1], [0, 0, 1, 1], [], []>} : vector<8x32xbf16>, vector<32x8xbf16>, vector<8x8xf32> -> vector<8x8xf32>
    %c0_19 = arith.constant 0 : index
    %c0_20 = arith.constant 0 : index
    %c0_21 = arith.constant 0 : index
    %19 = vector.load %arg9[%c0_19, %c0_20, %c0_21] : memref<1x1x8xf32, #tpu.memory_space<vmem>>, vector<1x1x8xf32>
    %20 = vector.shape_cast %19 : vector<1x1x8xf32> to vector<1x8xf32>
    %21 = vector.broadcast %20 : vector<1x8xf32> to vector<8x8xf32>
    %22 = arith.addf %18, %21 : vector<8x8xf32>
    %c0_22 = arith.constant 0 : index
    %c0_23 = arith.constant 0 : index
    %c0_24 = arith.constant 0 : index
    %23 = vector.load %arg10[%c0_22, %c0_23, %c0_24] : memref<1x32x8xbf16, #tpu.memory_space<vmem>>, vector<1x32x8xbf16>
    %24 = vector.shape_cast %23 : vector<1x32x8xbf16> to vector<32x8xbf16>
    %cst_25 = arith.constant dense<0.000000e+00> : vector<8x8xf32>
    %25 = tpu.matmul %8, %24, %cst_25 {dimension_numbers = #tpu.dot_dimension_numbers<[1], [0], [0], [1], [0, 0, 1, 1], [], []>} : vector<8x32xbf16>, vector<32x8xbf16>, vector<8x8xf32> -> vector<8x8xf32>
    %c0_26 = arith.constant 0 : index
    %c0_27 = arith.constant 0 : index
    %c0_28 = arith.constant 0 : index
    %26 = vector.load %arg11[%c0_26, %c0_27, %c0_28] : memref<1x1x8xf32, #tpu.memory_space<vmem>>, vector<1x1x8xf32>
    %27 = vector.shape_cast %26 : vector<1x1x8xf32> to vector<1x8xf32>
    %28 = vector.broadcast %27 : vector<1x8xf32> to vector<8x8xf32>
    %29 = arith.addf %25, %28 : vector<8x8xf32>
    %cst_29 = arith.constant 0.353553385 : f32
    %30 = vector.broadcast %cst_29 : f32 to vector<8x8xf32>
    %31 = arith.mulf %22, %30 : vector<8x8xf32>
    %32 = vector.shape_cast %31 : vector<8x8xf32> to vector<1x8x8xf32>
    %33 = arith.truncf %32 : vector<1x8x8xf32> to vector<1x8x8xbf16>
    %34 = vector.shape_cast %15 : vector<8x8xf32> to vector<1x8x8xf32>
    %35 = arith.truncf %34 : vector<1x8x8xf32> to vector<1x8x8xbf16>
    %36 = vector.shape_cast %29 : vector<8x8xf32> to vector<1x8x8xf32>
    %37 = arith.truncf %36 : vector<1x8x8xf32> to vector<1x8x8xbf16>
    "tpu.trace_start"() <{level = 10 : i32, message = "bqd,bkd->bqk"}> : () -> ()
    %cst_30 = arith.constant dense<0.000000e+00> : vector<1x8x8xf32>
    %38 = tpu.matmul %33, %35, %cst_30 {dimension_numbers = #tpu.dot_dimension_numbers<[2], [2], [1], [1], [0, 0, 0, 1, 1, 1], [0], [0]>} : vector<1x8x8xbf16>, vector<1x8x8xbf16>, vector<1x8x8xf32> -> vector<1x8x8xf32>
    "tpu.trace_stop"() : () -> ()
    %c0_31 = arith.constant 0 : index
    %c0_32 = arith.constant 0 : index
    %c0_33 = arith.constant 0 : index
    %39 = vector.load %arg24[%c0_31, %c0_32, %c0_33] : memref<1x8x8xf32, #tpu.memory_space<vmem>>, vector<1x8x8xf32>
    %40 = arith.addf %38, %39 : vector<1x8x8xf32>
    %cst_34 = arith.constant dense<0xFF800000> : vector<1x8xf32>
    %41 = vector.multi_reduction <maximumf>, %40, %cst_34 [2] : vector<1x8x8xf32> to vector<1x8xf32>
    %42 = vector.shape_cast %41 : vector<1x8xf32> to vector<1x8x1xf32>
    %43 = vector.broadcast %42 : vector<1x8x1xf32> to vector<1x8x8xf32>
    %44 = arith.subf %40, %43 : vector<1x8x8xf32>
    %45 = math.exp %44 : vector<1x8x8xf32>
    %cst_35 = arith.constant dense<0.000000e+00> : vector<1x8xf32>
    %46 = vector.multi_reduction <add>, %45, %cst_35 [2] : vector<1x8x8xf32> to vector<1x8xf32>
    %47 = vector.shape_cast %46 : vector<1x8xf32> to vector<1x8x1xf32>
    %48 = vector.broadcast %47 : vector<1x8x1xf32> to vector<1x8x8xf32>
    %49 = arith.divf %45, %48 : vector<1x8x8xf32>
    %50 = arith.truncf %49 : vector<1x8x8xf32> to vector<1x8x8xbf16>
    "tpu.trace_start"() <{level = 10 : i32, message = "bqk,bkd->bqd"}> : () -> ()
    %cst_36 = arith.constant dense<0.000000e+00> : vector<1x8x8xf32>
    %51 = tpu.matmul %50, %37, %cst_36 {dimension_numbers = #tpu.dot_dimension_numbers<[2], [1], [1], [2], [0, 0, 0, 1, 1, 2], [0], [0]>} : vector<1x8x8xbf16>, vector<1x8x8xbf16>, vector<1x8x8xf32> -> vector<1x8x8xf32>
    "tpu.trace_stop"() : () -> ()
    %c0_37 = arith.constant 0 : index
    %c0_38 = arith.constant 0 : index
    %52 = vector.load %arg23[%c0_37, %c0_38] : memref<8x32xf32, #tpu.memory_space<vmem>>, vector<8x32xf32>
    %53 = vector.shape_cast %51 : vector<1x8x8xf32> to vector<8x8xf32>
    %54 = arith.truncf %53 : vector<8x8xf32> to vector<8x8xbf16>
    %c0_39 = arith.constant 0 : index
    %c0_40 = arith.constant 0 : index
    %c0_41 = arith.constant 0 : index
    %55 = vector.load %arg12[%c0_39, %c0_40, %c0_41] : memref<1x8x32xbf16, #tpu.memory_space<vmem>>, vector<1x8x32xbf16>
    %56 = vector.shape_cast %55 : vector<1x8x32xbf16> to vector<8x32xbf16>
    %cst_42 = arith.constant dense<0.000000e+00> : vector<8x32xf32>
    %57 = tpu.matmul %54, %56, %cst_42 {dimension_numbers = #tpu.dot_dimension_numbers<[1], [0], [0], [1], [0, 0, 1, 1], [], []>} : vector<8x8xbf16>, vector<8x32xbf16>, vector<8x32xf32> -> vector<8x32xf32>
    %58 = arith.addf %52, %57 : vector<8x32xf32>
    %c0_43 = arith.constant 0 : index
    %c0_44 = arith.constant 0 : index
    %59 = vector.load %arg23[%c0_43, %c0_44] : memref<8x32xf32, #tpu.memory_space<vmem>>, vector<8x32xf32>
    tpu.vector_store %arg23[%c0_43, %c0_44], %58 {strides = array<i32>} : memref<8x32xf32, #tpu.memory_space<vmem>>, vector<8x32xf32>,
    %c3_i32 = arith.constant 3 : i32
    %60 = arith.cmpi eq, %arg1, %c3_i32 : i32
    %61 = arith.extui %60 : i1 to i32
    %c0_i32_45 = arith.constant 0 : i32
    %62 = arith.cmpi ne, %61, %c0_i32_45 : i32
    scf.if %62 {
      %c0_46 = arith.constant 0 : index
      %c0_47 = arith.constant 0 : index
      %63 = vector.load %arg23[%c0_46, %c0_47] : memref<8x32xf32, #tpu.memory_space<vmem>>, vector<8x32xf32>
      %c0_48 = arith.constant 0 : index
      %c0_49 = arith.constant 0 : index
      %64 = vector.load %arg13[%c0_48, %c0_49] : memref<1x32xf32, #tpu.memory_space<vmem>>, vector<1x32xf32>
      %65 = vector.broadcast %64 : vector<1x32xf32> to vector<8x32xf32>
      %66 = arith.addf %63, %65 : vector<8x32xf32>
      %c0_50 = arith.constant 0 : index
      %c0_51 = arith.constant 0 : index
      %67 = vector.load %arg14[%c0_50, %c0_51] : memref<1x32xf32, #tpu.memory_space<vmem>>, vector<1x32xf32>
      %c0_52 = arith.constant 0 : index
      %c0_53 = arith.constant 0 : index
      %68 = vector.load %arg15[%c0_52, %c0_53] : memref<1x32xf32, #tpu.memory_space<vmem>>, vector<1x32xf32>
      %cst_54 = arith.constant dense<0.000000e+00> : vector<8xf32>
      %69 = vector.multi_reduction <add>, %66, %cst_54 [1] : vector<8x32xf32> to vector<8xf32>
      %70 = vector.shape_cast %69 : vector<8xf32> to vector<8x1xf32>
      %cst_55 = arith.constant 3.200000e+01 : f32
      %71 = vector.broadcast %cst_55 : f32 to vector<8x1xf32>
      %72 = arith.divf %70, %71 : vector<8x1xf32>
      %73 = vector.broadcast %72 : vector<8x1xf32> to vector<8x32xf32>
      %74 = arith.subf %66, %73 : vector<8x32xf32>
      %75 = arith.mulf %74, %74 : vector<8x32xf32>
      %cst_56 = arith.constant dense<0.000000e+00> : vector<8xf32>
      %76 = vector.multi_reduction <add>, %75, %cst_56 [1] : vector<8x32xf32> to vector<8xf32>
      %77 = vector.shape_cast %76 : vector<8xf32> to vector<8x1xf32>
      %cst_57 = arith.constant 3.200000e+01 : f32
      %78 = vector.broadcast %cst_57 : f32 to vector<8x1xf32>
      %79 = arith.divf %77, %78 : vector<8x1xf32>
      %80 = vector.broadcast %72 : vector<8x1xf32> to vector<8x32xf32>
      %81 = arith.subf %66, %80 : vector<8x32xf32>
      %cst_58 = arith.constant 9.99999974E-6 : f32
      %82 = vector.broadcast %cst_58 : f32 to vector<8x1xf32>
      %83 = arith.addf %79, %82 : vector<8x1xf32>
      %84 = math.rsqrt %83 : vector<8x1xf32>
      %85 = vector.broadcast %84 : vector<8x1xf32> to vector<8x32xf32>
      %86 = arith.mulf %81, %85 : vector<8x32xf32>
      %87 = vector.broadcast %67 : vector<1x32xf32> to vector<8x32xf32>
      %88 = arith.mulf %86, %87 : vector<8x32xf32>
      %89 = vector.broadcast %68 : vector<1x32xf32> to vector<8x32xf32>
      %90 = arith.addf %88, %89 : vector<8x32xf32>
      %91 = arith.truncf %90 : vector<8x32xf32> to vector<8x32xbf16>
      %c0_59 = arith.constant 0 : index
      %c0_60 = arith.constant 0 : index
      %92 = vector.load %arg16[%c0_59, %c0_60] : memref<32x32xbf16, #tpu.memory_space<vmem>>, vector<32x32xbf16>
      %cst_61 = arith.constant dense<0.000000e+00> : vector<8x32xf32>
      %93 = tpu.matmul %91, %92, %cst_61 {dimension_numbers = #tpu.dot_dimension_numbers<[1], [0], [0], [1], [0, 0, 1, 1], [], []>} : vector<8x32xbf16>, vector<32x32xbf16>, vector<8x32xf32> -> vector<8x32xf32>
      %c0_62 = arith.constant 0 : index
      %c0_63 = arith.constant 0 : index
      %94 = vector.load %arg17[%c0_62, %c0_63] : memref<1x32xf32, #tpu.memory_space<vmem>>, vector<1x32xf32>
      %95 = vector.broadcast %94 : vector<1x32xf32> to vector<8x32xf32>
      %96 = arith.addf %93, %95 : vector<8x32xf32>
      %cst_64 = arith.constant 0.000000e+00 : f32
      %97 = vector.broadcast %cst_64 : f32 to vector<8x32xf32>
      %98 = arith.maximumf %96, %97 : vector<8x32xf32>
      %99 = arith.truncf %98 : vector<8x32xf32> to vector<8x32xbf16>
      %c0_65 = arith.constant 0 : index
      %c0_66 = arith.constant 0 : index
      %100 = vector.load %arg18[%c0_65, %c0_66] : memref<32x32xbf16, #tpu.memory_space<vmem>>, vector<32x32xbf16>
      %cst_67 = arith.constant dense<0.000000e+00> : vector<8x32xf32>
      %101 = tpu.matmul %99, %100, %cst_67 {dimension_numbers = #tpu.dot_dimension_numbers<[1], [0], [0], [1], [0, 0, 1, 1], [], []>} : vector<8x32xbf16>, vector<32x32xbf16>, vector<8x32xf32> -> vector<8x32xf32>
      %c0_68 = arith.constant 0 : index
      %c0_69 = arith.constant 0 : index
      %102 = vector.load %arg19[%c0_68, %c0_69] : memref<1x32xf32, #tpu.memory_space<vmem>>, vector<1x32xf32>
      %103 = vector.broadcast %102 : vector<1x32xf32> to vector<8x32xf32>
      %104 = arith.addf %101, %103 : vector<8x32xf32>
      %c0_70 = arith.constant 0 : index
      %c0_71 = arith.constant 0 : index
      %105 = vector.load %arg20[%c0_70, %c0_71] : memref<1x32xf32, #tpu.memory_space<vmem>>, vector<1x32xf32>
      %c0_72 = arith.constant 0 : index
      %c0_73 = arith.constant 0 : index
      %106 = vector.load %arg21[%c0_72, %c0_73] : memref<1x32xf32, #tpu.memory_space<vmem>>, vector<1x32xf32>
      %cst_74 = arith.constant dense<0.000000e+00> : vector<8xf32>
      %107 = vector.multi_reduction <add>, %104, %cst_74 [1] : vector<8x32xf32> to vector<8xf32>
      %108 = vector.shape_cast %107 : vector<8xf32> to vector<8x1xf32>
      %cst_75 = arith.constant 3.200000e+01 : f32
      %109 = vector.broadcast %cst_75 : f32 to vector<8x1xf32>
      %110 = arith.divf %108, %109 : vector<8x1xf32>
      %111 = vector.broadcast %110 : vector<8x1xf32> to vector<8x32xf32>
      %112 = arith.subf %104, %111 : vector<8x32xf32>
      %113 = arith.mulf %112, %112 : vector<8x32xf32>
      %cst_76 = arith.constant dense<0.000000e+00> : vector<8xf32>
      %114 = vector.multi_reduction <add>, %113, %cst_76 [1] : vector<8x32xf32> to vector<8xf32>
      %115 = vector.shape_cast %114 : vector<8xf32> to vector<8x1xf32>
      %cst_77 = arith.constant 3.200000e+01 : f32
      %116 = vector.broadcast %cst_77 : f32 to vector<8x1xf32>
      %117 = arith.divf %115, %116 : vector<8x1xf32>
      %118 = vector.broadcast %110 : vector<8x1xf32> to vector<8x32xf32>
      %119 = arith.subf %104, %118 : vector<8x32xf32>
      %cst_78 = arith.constant 9.99999974E-6 : f32
      %120 = vector.broadcast %cst_78 : f32 to vector<8x1xf32>
      %121 = arith.addf %117, %120 : vector<8x1xf32>
      %122 = math.rsqrt %121 : vector<8x1xf32>
      %123 = vector.broadcast %122 : vector<8x1xf32> to vector<8x32xf32>
      %124 = arith.mulf %119, %123 : vector<8x32xf32>
      %125 = vector.broadcast %105 : vector<1x32xf32> to vector<8x32xf32>
      %126 = arith.mulf %124, %125 : vector<8x32xf32>
      %127 = vector.broadcast %106 : vector<1x32xf32> to vector<8x32xf32>
      %128 = arith.addf %126, %127 : vector<8x32xf32>
      %129 = arith.addf %90, %128 : vector<8x32xf32>
      %130 = vector.shape_cast %129 : vector<8x32xf32> to vector<1x8x32xf32>
      %c0_79 = arith.constant 0 : index
      %c0_80 = arith.constant 0 : index
      %c0_81 = arith.constant 0 : index
      %131 = vector.load %arg22[%c0_79, %c0_80, %c0_81] : memref<1x8x32xf32, #tpu.memory_space<vmem>>, vector<1x8x32xf32>
      tpu.vector_store %arg22[%c0_79, %c0_80, %c0_81], %130 {strides = array<i32>} : memref<1x8x32xf32, #tpu.memory_space<vmem>>, vector<1x8x32xf32>,
    } else {
    }
    return
  }
  func.func @transform_0(%arg0: i32, %arg1: i32) -> (i32, i32, i32) {
    %c0_i32 = arith.constant 0 : i32
    %c0_i32_0 = arith.constant 0 : i32
    %c0_i32_1 = arith.constant 0 : i32
    return %arg0, %c0_i32, %c0_i32_0 : i32, i32, i32
  }
  func.func @transform_1(%arg0: i32, %arg1: i32) -> (i32, i32, i32) {
    %c0_i32 = arith.constant 0 : i32
    %c0_i32_0 = arith.constant 0 : i32
    %c0_i32_1 = arith.constant 0 : i32
    return %arg0, %c0_i32, %c0_i32_0 : i32, i32, i32
  }
  func.func @transform_2(%arg0: i32, %arg1: i32) -> (i32, i32, i32) {
    %c0_i32 = arith.constant 0 : i32
    %c0_i32_0 = arith.constant 0 : i32
    %c0_i32_1 = arith.constant 0 : i32
    return %arg0, %c0_i32, %c0_i32_0 : i32, i32, i32
  }
  func.func @transform_3(%arg0: i32, %arg1: i32) -> (i32, i32, i32) {
    %c0_i32 = arith.constant 0 : i32
    %c0_i32_0 = arith.constant 0 : i32
    %c0_i32_1 = arith.constant 0 : i32
    return %arg0, %c0_i32, %c0_i32_0 : i32, i32, i32
  }
  func.func @transform_4(%arg0: i32, %arg1: i32) -> (i32, i32, i32) {
    %c0_i32 = arith.constant 0 : i32
    %c0_i32_0 = arith.constant 0 : i32
    %c0_i32_1 = arith.constant 0 : i32
    return %arg1, %c0_i32, %c0_i32_0 : i32, i32, i32
  }
  func.func @transform_5(%arg0: i32, %arg1: i32) -> (i32, i32, i32) {
    %c0_i32 = arith.constant 0 : i32
    %c0_i32_0 = arith.constant 0 : i32
    %c0_i32_1 = arith.constant 0 : i32
    return %arg1, %c0_i32, %c0_i32_0 : i32, i32, i32
  }
  func.func @transform_6(%arg0: i32, %arg1: i32) -> (i32, i32, i32) {
    %c0_i32 = arith.constant 0 : i32
    %c0_i32_0 = arith.constant 0 : i32
    %c0_i32_1 = arith.constant 0 : i32
    return %arg1, %c0_i32, %c0_i32_0 : i32, i32, i32
  }
  func.func @transform_7(%arg0: i32, %arg1: i32) -> (i32, i32, i32) {
    %c0_i32 = arith.constant 0 : i32
    %c0_i32_0 = arith.constant 0 : i32
    %c0_i32_1 = arith.constant 0 : i32
    return %arg1, %c0_i32, %c0_i32_0 : i32, i32, i32
  }
  func.func @transform_8(%arg0: i32, %arg1: i32) -> (i32, i32, i32) {
    %c0_i32 = arith.constant 0 : i32
    %c0_i32_0 = arith.constant 0 : i32
    %c0_i32_1 = arith.constant 0 : i32
    return %arg1, %c0_i32, %c0_i32_0 : i32, i32, i32
  }
  func.func @transform_9(%arg0: i32, %arg1: i32) -> (i32, i32, i32) {
    %c0_i32 = arith.constant 0 : i32
    %c0_i32_0 = arith.constant 0 : i32
    %c0_i32_1 = arith.constant 0 : i32
    return %arg1, %c0_i32, %c0_i32_0 : i32, i32, i32
  }
  func.func @transform_10(%arg0: i32, %arg1: i32) -> (i32, i32, i32) {
    %c0_i32 = arith.constant 0 : i32
    %c0_i32_0 = arith.constant 0 : i32
    %c0_i32_1 = arith.constant 0 : i32
    return %arg1, %c0_i32, %c0_i32_0 : i32, i32, i32
  }
  func.func @transform_11(%arg0: i32, %arg1: i32) -> (i32, i32) {
    %c0_i32 = arith.constant 0 : i32
    %c0_i32_0 = arith.constant 0 : i32
    %c0_i32_1 = arith.constant 0 : i32
    return %c0_i32, %c0_i32_0 : i32, i32
  }
  func.func @transform_12(%arg0: i32, %arg1: i32) -> (i32, i32) {
    %c0_i32 = arith.constant 0 : i32
    %c0_i32_0 = arith.constant 0 : i32
    %c0_i32_1 = arith.constant 0 : i32
    return %c0_i32, %c0_i32_0 : i32, i32
  }
  func.func @transform_13(%arg0: i32, %arg1: i32) -> (i32, i32) {
    %c0_i32 = arith.constant 0 : i32
    %c0_i32_0 = arith.constant 0 : i32
    %c0_i32_1 = arith.constant 0 : i32
    return %c0_i32, %c0_i32_0 : i32, i32
  }
  func.func @transform_14(%arg0: i32, %arg1: i32) -> (i32, i32) {
    %c0_i32 = arith.constant 0 : i32
    %c0_i32_0 = arith.constant 0 : i32
    %c0_i32_1 = arith.constant 0 : i32
    return %c0_i32, %c0_i32_0 : i32, i32
  }
  func.func @transform_15(%arg0: i32, %arg1: i32) -> (i32, i32) {
    %c0_i32 = arith.constant 0 : i32
    %c0_i32_0 = arith.constant 0 : i32
    %c0_i32_1 = arith.constant 0 : i32
    return %c0_i32, %c0_i32_0 : i32, i32
  }
  func.func @transform_16(%arg0: i32, %arg1: i32) -> (i32, i32) {
    %c0_i32 = arith.constant 0 : i32
    %c0_i32_0 = arith.constant 0 : i32
    %c0_i32_1 = arith.constant 0 : i32
    return %c0_i32, %c0_i32_0 : i32, i32
  }
  func.func @transform_17(%arg0: i32, %arg1: i32) -> (i32, i32) {
    %c0_i32 = arith.constant 0 : i32
    %c0_i32_0 = arith.constant 0 : i32
    %c0_i32_1 = arith.constant 0 : i32
    return %c0_i32, %c0_i32_0 : i32, i32
  }
  func.func @transform_18(%arg0: i32, %arg1: i32) -> (i32, i32) {
    %c0_i32 = arith.constant 0 : i32
    %c0_i32_0 = arith.constant 0 : i32
    %c0_i32_1 = arith.constant 0 : i32
    return %c0_i32, %c0_i32_0 : i32, i32
  }
  func.func @transform_19(%arg0: i32, %arg1: i32) -> (i32, i32) {
    %c0_i32 = arith.constant 0 : i32
    %c0_i32_0 = arith.constant 0 : i32
    %c0_i32_1 = arith.constant 0 : i32
    return %c0_i32, %c0_i32_0 : i32, i32
  }
  func.func @transform_20(%arg0: i32, %arg1: i32) -> (i32, i32, i32) {
    %c0_i32 = arith.constant 0 : i32
    %c0_i32_0 = arith.constant 0 : i32
    %c0_i32_1 = arith.constant 0 : i32
    return %arg0, %c0_i32, %c0_i32_0 : i32, i32, i32
  }
}

</mosaic_0001>

<bundles_post_ra>
// kernel: multi_head_attention_forward.1
= control target key start
LH: loop header
LB: loop body
LE: loop exit
PB: predicated region body
PF: predicated region fallthrough
CT: control target
= control target key end

     0   :  { %s1920_s22 = smov 0   ;;  %s1922_s23 = smov 0   ;;  %s2121_s0 = inlined_call_operand.vmem [shape: bf16[2,8,32], index: 0, kind: input, shape index: {}]   ;;  %s2122_s1 = inlined_call_operand.vmem [shape: bf16[2,8,32], index: 1, kind: input, shape index: {}]   ;;  %s2123_s2 = inlined_call_operand.vmem [shape: bf16[2,8,32], index: 2, kind: input, shape index: {}]   ;;  %s2124_s3 = inlined_call_operand.vmem [shape: f32[2,1,8], index: 3, kind: input, shape index: {}]   ;;  %s2125_s4 = inlined_call_operand.vmem [shape: bf16[4,32,8], index: 4, kind: input, shape index: {}]   ;;  %s2126_s5 = inlined_call_operand.vmem [shape: f32[4,1,8], index: 5, kind: input, shape index: {}]   ;;  %s2127_s6 = inlined_call_operand.vmem [shape: bf16[4,32,8], index: 6, kind: input, shape index: {}]   ;;  %s2128_s7 = inlined_call_operand.vmem [shape: f32[4,1,8], index: 7, kind: input, shape index: {}]   ;;  %s2129_s8 = inlined_call_operand.vmem [shape: bf16[4,32,8], index: 8, kind: input, shape index: {}]   ;;  %s2130_s9 = inlined_call_operand.vmem [shape: f32[4,1,8], index: 9, kind: input, shape index: {}]   ;;  %s2131_s10 = inlined_call_operand.vmem [shape: bf16[4,8,32], index: 10, kind: input, shape index: {}]   ;;  %s2132_s11 = inlined_call_operand.vmem [shape: f32[1,32], index: 11, kind: input, shape index: {}]   ;;  %s2133_s12 = inlined_call_operand.vmem [shape: f32[1,32], index: 12, kind: input, shape index: {}]   ;;  %s2134_s13 = inlined_call_operand.vmem [shape: f32[1,32], index: 13, kind: input, shape index: {}]   ;;  %s2135_s14 = inlined_call_operand.vmem [shape: bf16[32,32], index: 14, kind: input, shape index: {}]   ;;  %s2136_s15 = inlined_call_operand.vmem [shape: f32[1,32], index: 15, kind: input, shape index: {}]   ;;  %s2137_s16 = inlined_call_operand.vmem [shape: bf16[32,32], index: 16, kind: input, shape index: {}]   ;;  %s2138_s17 = inlined_call_operand.vmem [shape: f32[1,32], index: 17, kind: input, shape index: {}]   ;;  %s2139_s18 = inlined_call_operand.vmem [shape: f32[1,32], index: 18, kind: input, shape index: {}]   ;;  %s2140_s19 = inlined_call_operand.vmem [shape: f32[1,32], index: 19, kind: input, shape index: {}]   ;;  %s2141_s20 = inlined_call_operand.vmem [shape: f32[2,8,32], index: 20, kind: output, shape index: {}]  }
   0x1   :  { %2148 = sst [smem:[#allocation10_spill]] %s2121_s0  ;;  %s1924_s24 = smov 0  }
   0x2   :  { %2149 = sst [smem:[#allocation11_spill]] %s2122_s1  ;;  %s1918_s1 = smov 0  }
   0x3   :  { %2150 = sst [smem:[#allocation12_spill]] %s2123_s2  ;;  %s1926_s2 = smov 0  }
   0x4   :  { %2151 = sst [smem:[#allocation13_spill]] %s2124_s3 }
   0x5   :  { %2152 = sst [smem:[#allocation14_spill]] %s2125_s4 }
   0x6   :  { %2153 = sst [smem:[#allocation15_spill]] %s2132_s11 }
   0x7   :  { %2154 = sst [smem:[#allocation16_spill]] %s2133_s12 }
   0x8   :  { %2155 = sst [smem:[#allocation17_spill]] %s2134_s13 }
   0x9   :  { %2156 = sst [smem:[#allocation18_spill]] %s2135_s14 }
   0xa   :  { %2157 = sst [smem:[#allocation19_spill]] %s2136_s15 }
   0xb   :  { %2158 = sst [smem:[#allocation20_spill]] %s2137_s16 }
   0xc   :  { %2159 = sst [smem:[#allocation21_spill]] %s2138_s17 }
   0xd   :  { %2160 = sst [smem:[#allocation22_spill]] %s2139_s18 }
   0xe   :  { %2161 = sst [smem:[#allocation23_spill]] %s2140_s19 }
   0xf LB: > { %2162 = sst [smem:[#allocation4_spill]] %s1789_s1  ;;  %s39_s25 = sadd.s32 1, %s1797_s23  ;;  %s1805_s2 = sphi %s1926_s2, %s30_s2   ;;  %s1801_s24 = sphi %s1924_s24, %s2194_s24   ;;  %s1797_s23 = sphi %s1922_s23, %s2193_s23   ;;  %s1793_s22 = sphi %s1920_s22, %s2192_s22   ;;  %s1789_s1 = sphi %s1918_s1, %s2191_s1  }
  0x10   : > { %2163 = sst [smem:[#allocation5_spill]] %s1797_s23  ;;  %s42_s3 = sadd.s32 1, %s1801_s24 }
  0x11   : > { %2164 = sst [smem:[#allocation6_spill]] %s1801_s24  ;;  %p40_p0 = scmp.ge.s32.totalorder %s39_s25, 4 }
  0x12   : > { %2165 = sst [smem:[#allocation7_spill]] %s1805_s2  ;;  %p1577_p1 = scmp.ge.s32.totalorder %s1805_s2, 1 }
  0x13   : > { %p662_p2 = scmp.lt.s32.totalorder %s1805_s2, 9  ;;  %s2196_s25 = smov (%p40_p0, %s39_s25), 0 }
  0x14   : > { %2166 = sst [smem:[#allocation8_spill]] %s2196_s25  ;;  %s2198_s3 = smov (!%p40_p0, %s42_s3), %s1801_s24 }
  0x15   : > { %p663_p3 = pnand %p1577_p1, %p662_p2  ;;  %p44_p4 = scmp.ge.s32.totalorder %s2198_s3, 2 }
  0x16   : > { %p757_p5 = scmp.lt.s32.totalorder (!%p663_p3), %s1793_s22, 1  ;;  %p772_p6 = scmp.lt.s32.totalorder (!%p663_p3), %s1789_s1, 3 }
  0x17   : > { %s2200_s3 = smov (%p44_p4, %s2198_s3), 0  ;;  %666 = sbr.rel (%p663_p3) target bundleno = 2315 (0x90b), region = 100 }
  0x18   : > { %2167 = sst [smem:[#allocation9_spill]] %s2200_s3  ;;  %s2168_s29 = sld [smem:[#allocation13_spill]] (!%p663_p3) }
  0x19   : > { %s2169_s3 = sld [smem:[#allocation10_spill]] (!%p663_p3)  ;;  %s2172_s28 = sld [smem:[#allocation14_spill]] (!%p663_p3) }
  0x1a   : > { %s2173_s24 = sld [smem:[#allocation4_spill]] (!%p663_p3) }
  0x1e   : > { %s2202_s22 = smov (!%p757_p5, %s1793_s22), 1 }
  0x1f   : > { %s1952_s26 = scalar_select %p772_p6, %s1789_s1, 3 }
  0x20   : > { %s1954_s27 = sshll.u32 %s2202_s22, 2  ;;  %s771_s30 = scalar_lea.vmem %s2168_s29, %s2202_s22 }
  0x21   : > { %s760_s25 = scalar_lea.vmem %s2169_s3, %s1954_s27  ;;  %s1621_s13 = sshll.u32 %s1952_s26, 4 }
  0x22   : > { %s1975_s4 = scalar_lea.vmem %s2172_s28, %s1621_s13  ;;  %s1984_s21 = scalar_lea.vmem %s2127_s6, %s1621_s13 }
  0x23   : > { %s787_s17 = scalar_lea.vmem %s2128_s7, %s1952_s26  ;;  %s1993_s2 = scalar_lea.vmem %s2129_s8, %s1621_s13 }
  0x24   : > { %s795_s28 = scalar_lea.vmem %s2130_s9, %s1952_s26  ;;  %s1587_s11 = sshll.u32 %s1952_s26, 2 }
  0x25   : > { %s1588_s29 = sshll.u32 %s2202_s22, 3  ;;  %s2003_s0 = scalar_lea.vmem %s2131_s10, %s1587_s11 }
  0x26   : > { %s2008_s23 = scalar_lea.vmem %s2141_s20, %s1588_s29  ;;  %p1589_p7 = scmp.ne.s32.totalorder %s2173_s24, 0 }
  0x27   : > { %vm809_vm0 = vcmask (!%p1589_p7), 261120   ;;  %v811_v0 = vld [vmem:[%s771_s30] sm:$0x1] (!%p1589_p7)  ;;  %v813_v1 = vlaneseq (!%p1589_p7)  ;;  %v1807_v2 = vmov (!%p1589_p7), 0.0   ;;  %v1808_v5 = vmov (!%p1589_p7), 0  }
  0x28   : > { %808 = sbr.rel (%p1589_p7) target bundleno = 51 (0x33), region = 104  ;;  %810 = vst.msk [vmem:[#allocation2] sm:$0xff] (!%p1589_p7), %vm809_vm0, %v1807_v2  ;;  %vm812_vm1 = vcmp.eq.f32.partialorder (!%p1589_p7), %v811_v0, 0.0  ;;  %vm826_vm4 = vcmask (!%p1589_p7), 64512  }
  0x29   : > { %v814_v3 = vshrl.u32 (!%p1589_p7), %v813_v1, 7  ;;  %v816_v4 = vand.u32 (!%p1589_p7), 127, %v813_v1  ;;  %v818_v6 = vsel (!%p1589_p7), %vm812_vm1, 1, %v1808_v5 }
  0x2b   : > { %v821_v7 = vsub.s32 (!%p1589_p7), 0, %v814_v3  ;;  %vm817_vm2 = vcmp.eq.s32.totalorder (!%p1589_p7), %v814_v3, %v816_v4 }
  0x2d   : > { %v822_v8 = vrot.slane (!%p1589_p7), %v818_v6, %v821_v7 }
  0x2f   : > { %vm823_vm3 = vcmp.eq.s32.totalorder %v822_v8, 1 }
  0x30   : > { %vm824_vm5 = vmor %vm823_vm3, %vm817_vm2 }
  0x31   : > { %v825_v9 = vsel %vm824_vm5, -1e+32, %v1807_v2 }
  0x32   : > { %827 = vst.msk [vmem:[#allocation3] sm:$0xff] %vm826_vm4, %v825_v9 }
  0x33 PF: > { %v1749_v10 = vld [vmem:[%s1975_s4] sm:$0xff]   ;;  %v1809_v11 = vmov 0.0   ;;  %v1750_v12 = vld [vmem:[%s1975_s4 + $0x8] sm:$0xff]   ;;  %vm1810_vm6 = vmmov 0   ;;  %vm854_vm7 = vcmask 261120   ;;  %s2175_s30 = sld [smem:[#allocation11_spill]] }
  0x34   : > { %1645 = vmatprep.subr.bf16.mxu0 %v1809_v11  ;;  %1653 = vmatprep.subr.bf16.mxu1 %v1809_v11  ;;  %v1751_v13 = vld [vmem:[%s1984_s21] sm:$0xff]   ;;  %v1752_v14 = vld [vmem:[%s1984_s21 + $0x8] sm:$0xff]   ;;  %vm1035_vm8 = vcmask 64512   ;;  %s2178_s11 = sld [smem:[#allocation12_spill]]  ;;  %vm1097_vm9 = vcmask 1043456  }
  0x35   : > { %1646 = vmatpush3.bf16.msra.mxu0 %v1749_v10  ;;  %1649 = vmatprep.mubr.msk.bf16.mxu0 %vm1810_vm6, %v1809_v11  ;;  %v828_v15 = vld [vmem:[%s760_s25] sm:$0xf]  ;;  %s2177_s25 = scalar_lea.vmem %s2126_s5, %s1952_s26  ;;  %v1754_v34 = vld [vmem:[%s1993_s2 + $0x8] sm:$0xff]   ;;  %s2180_s26 = sld [smem:[#allocation4_spill]] }
  0x36   : > { %1647 = vmatprep.subr.bf16.mxu0 %v1809_v11  ;;  %1657 = vmatprep.mubr.msk.bf16.mxu1 %vm1810_vm6, %v1809_v11  ;;  %v1590_v17 = vld [vmem:[%s2177_s25] ss:$0 sm:$0xff] }
  0x37   : > { %1654 = vmatpush3.bf16.msra.mxu1 %v1751_v13  ;;  %v1594_v19 = vld [vmem:[%s787_s17] ss:$0 sm:$0xff] }
  0x38   : > { %1655 = vmatprep.subr.bf16.mxu1 %v1809_v11  ;;  %v1753_v33 = vld [vmem:[%s1993_s2] sm:$0xff]  }
  0x39   : > { %1648 = vmatpush3.bf16.msra.mxu0 %v1750_v12  ;;  %s2176_s4 = scalar_lea.vmem %s2175_s30, %s1954_s27  ;;  %v1034_v36 = vld [vmem:[#allocation3] sm:$0xff]  ;;  %v1598_v51 = vld [vmem:[%s795_s28] ss:$0 sm:$0xff] }
  0x3a   : > { %1661 = vmatprep.subr.bf16.mxu0 %v1809_v11  ;;  %v829_v16 = vld [vmem:[%s2176_s4] sm:$0xf]  ;;  %s2179_s29 = scalar_lea.vmem %s2178_s11, %s1954_s27 }
  0x3b   : > { %1656 = vmatpush3.bf16.msra.mxu1 %v1752_v14  ;;  %v830_v35 = vld [vmem:[%s2179_s29] sm:$0xf]  ;;  %p1605_p8 = scmp.ne.s32.totalorder %s2180_s26, 3 }
  0x3c   : > { %1650 = vmatmul.mubr.msk.bf16.vlgmr.msra.gmra.mrb[0].mxu0 %vm854_vm7, %v828_v15  ;;  %1669 = vmatprep.subr.bf16.mxu1 %v1809_v11  ;;  %v1143_v56 = vld [vmem:[%s2003_s0] sm:$0xf]  ;;  %s2181_s3 = sld [smem:[#allocation15_spill]] (!%p1605_p8)  ;;  %s2182_s16 = sld [smem:[#allocation18_spill]] (!%p1605_p8)  ;;  %vm1812_vm10 = vmmov (!%p1605_p8), 0  }
  0x3d   : > { %1665 = vmatprep.mubr.msk.bf16.mxu0 %vm1810_vm6, %v1809_v11  ;;  %1662 = vmatpush3.bf16.msra.mxu0 %v1753_v33  ;;  %v1148_v57 = vsel %vm1097_vm9, %v1143_v56, 0  ;;  %v1141_v3 = vld [vmem:[#allocation2] sm:$0xff]  ;;  %s2183_s4 = sld [smem:[#allocation16_spill]] (!%p1605_p8)  ;;  %s2184_s25 = sld [smem:[#allocation17_spill]] (!%p1605_p8) }
  0x3e   : > { %1658 = vmatmul.mubr.msk.bf16.vlgmr.msra.gmra.mrb[0].mxu1 %vm854_vm7, %v829_v16  ;;  %1663 = vmatprep.subr.bf16.mxu0 %v1809_v11  ;;  %s2185_s17 = sld [smem:[#allocation20_spill]] (!%p1605_p8)  ;;  %s2186_s2 = sld [smem:[#allocation19_spill]] (!%p1605_p8) }
  0x3f   : > { %1671 = vmatprep.mubr.msk.bf16.mxu1 %vm1810_vm6, %v1809_v11  ;;  %s2187_s0 = sld [smem:[#allocation21_spill]] (!%p1605_p8)  ;;  %s2188_s13 = sld [smem:[#allocation22_spill]] (!%p1605_p8) }
  0x40   : > { %s2189_s22 = sld [smem:[#allocation23_spill]] (!%p1605_p8) }
  0x41   : > { %1664 = vmatpush3.bf16.msra.mxu0 %v1754_v34 }
  0x42   : > { %1675 = vmatprep.subr.bf16.mxu0 %v1809_v11  ;;  %v1606_v10 = vld [vmem:[%s2181_s3] ss:$0 sm:$0xff] (!%p1605_p8) }
  0x44   : > { %1666 = vmatmul.mubr.msk.bf16.vlgmr.msra.gmra.mrb[4].mxu0 %vm854_vm7, %v830_v35  ;;  %v1609_v33 = vld [vmem:[%s2186_s2] ss:$0 sm:$0xff] (!%p1605_p8) }
  0x45   : > { %1677 = vmatprep.mubr.msk.bf16.mxu0 %vm1810_vm6, %v1809_v11 }
 0x10f   : > { %v892_v18 = vpop.f32.mrb[0].mxu0 }
 0x110   : > { %v893_v20 = vadd.f32 %v1590_v17, %v892_v18  ;;  %v1651_v21 = vpop.f32.mrb[1].mxu0  ;;  %v1759_v18 = vld [vmem:[%s2182_s16] sm:$0xff] (!%p1605_p8)  }
 0x111   : > { %v895_v22 = vpop.f32.mrb[2].mxu0  ;;  %v958_v23 = vpop.f32.mrb[0].mxu1 }
 0x112   : > { %v1032_v24 = vpack.c.bf16 %v893_v20, %v893_v20  ;;  %v1652_v25 = vpop.f32.mrb[3].mxu0  ;;  %v959_v26 = vadd.f32 %v1594_v19, %v958_v23  ;;  %v1659_v27 = vpop.f32.mrb[1].mxu1  ;;  %v1811_v19 = vmov (!%p1605_p8), 0.0   ;;  %v1760_v20 = vld [vmem:[%s2182_s16 + $0x8] sm:$0xff] (!%p1605_p8)  }
 0x113   : > { %v961_v28 = vpop.f32.mrb[2].mxu1  ;;  %v1607_v25 = vld [vmem:[%s2183_s4] ss:$0 sm:$0xff] (!%p1605_p8) }
 0x114   : > { %v1040_v29 = vsel %vm1035_vm8, %v1032_v24, 0  ;;  %v1030_v30 = vmul.f32 0.35355338, %v959_v26  ;;  %v1660_v31 = vpop.f32.mrb[3].mxu1  ;;  %v1608_v27 = vld [vmem:[%s2184_s25] ss:$0 sm:$0xff] (!%p1605_p8) }
 0x115   : > { %1670 = vmatpush3.bf16.xpose.msra.mxu1 %v1040_v29  ;;  %v1761_v31 = vld [vmem:[%s2185_s17] sm:$0xff] (!%p1605_p8)  }
 0x116   : > { %1681 = vmatprep.subr.bf16.mxu1 %v1809_v11  ;;  %v1031_v32 = vpack.c.bf16 %v1030_v30, %v1030_v30 }
 0x117   : > { %v1024_v48 = vpop.f32.mrb[4].mxu0 }
 0x118   : > { %v1667_v49 = vpop.f32.mrb[5].mxu0  ;;  %v1025_v53 = vadd.f32 %v1598_v51, %v1024_v48 }
 0x119   : > { %v1027_v50 = vpop.f32.mrb[6].mxu0 }
 0x11a   : > { %v1668_v52 = vpop.f32.mrb[7].mxu0  ;;  %v1033_v54 = vpack.c.bf16 %v1025_v53, %v1025_v53 }
 0x11c   : > { %1672 = vmatmul.mubr.msk.bf16.vlgmr.msra.gmra.mrb[4].mxu1 %vm1035_vm8, %v1031_v32  ;;  %v1099_v55 = vsel %vm1097_vm9, %v1033_v54, 0  ;;  %v1762_v32 = vld [vmem:[%s2185_s17 + $0x8] sm:$0xff] (!%p1605_p8)  }
 0x11d   : > { %1683 = vmatprep.mubr.msk.bf16.mxu1 %vm1810_vm6, %v1809_v11  ;;  %1676 = vmatpush3.bf16.msra.mxu0 %v1099_v55 }
 0x11e   : > { %1682 = vmatpush3.bf16.msra.mxu1 %v1148_v57  ;;  %1687 = vmatprep.subr.bf16.mxu0 (!%p1605_p8), %v1811_v19  ;;  %v1617_v57 = vld [vmem:[%s2188_s13] ss:$0 sm:$0xff] (!%p1605_p8) }
 0x11f   : > { %1695 = vmatprep.subr.bf16.mxu1 (!%p1605_p8), %v1811_v19 }
 0x1ef   : > { %v1076_v37 = vpop.f32.mrb[4].mxu1 }
 0x1f0   : > { %v1077_v38 = vadd.f32 %v1076_v37, %v1034_v36  ;;  %v1673_v39 = vpop.f32.mrb[5].mxu1 }
 0x1f1   : > { %v1079_v40 = vpop.f32.mrb[6].mxu1 }
 0x1f2   : > { %v1674_v41 = vpop.f32.mrb[7].mxu1  ;;  %v1082_v42 = vsel %vm1035_vm8, %v1077_v38, -inf }
 0x1f3   : > { %1083 = vmax.xlane.f32.xlu0 %v1082_v42  ;;  %v1613_v41 = vld [vmem:[%s2187_s0] ss:$0 sm:$0xff] (!%p1605_p8) }
 0x280   : > { %v1084_v43 = vpop.xlane.xlu0 %1083 }
 0x281   : > { %v1085_v44 = vsub.f32 %v1077_v38, %v1084_v43 }
 0x283   : > { %v1086_v45 = vmul.f32 1.442695, %v1085_v44 }
 0x285   : > { %1755 = vpow2.f32 %v1086_v45 }
 0x28f   : > { %v1756_v46 = vpop.eup %1755 }
 0x290   : > { %v1088_v47 = vsel %vm1035_vm8, %v1756_v46, 0.0 }
 0x291   : > { %1089 = vadd.xlane.f32.xlu0 %v1088_v47 }
 0x31e   : > { %v1090_v58 = vpop.xlane.xlu0 %1089 }
 0x31f   : > { %1757 = vrcp.f32 %v1090_v58 }
 0x329   : > { %v1758_v59 = vpop.eup %1757 }
 0x32a   : > { %v1092_v60 = vmul.f32 %v1758_v59, %v1756_v46  ;;  %v1618_v59 = vld [vmem:[%s2189_s22] ss:$0 sm:$0xff] (!%p1605_p8) }
 0x32c   : > { %v1093_v61 = vpack.c.bf16 %v1092_v60, %v1092_v60 }
 0x32e   : > { %1678 = vmatmul.mubr.msk.bf16.vlgmr.msra.gmra.mrb[8].mxu0 %vm1035_vm8, %v1093_v61 }
 0x32f   : > { %1691 = vmatprep.mubr.msk.bf16.mxu0 (!%p1605_p8), %vm1812_vm10, %v1811_v19  ;;  %1688 = vmatpush3.bf16.msra.mxu0 (!%p1605_p8), %v1759_v18 }
 0x330   : > { %1689 = vmatprep.subr.bf16.mxu0 (!%p1605_p8), %v1811_v19 }
 0x333   : > { %1690 = vmatpush3.bf16.msra.mxu0 (!%p1605_p8), %v1760_v20 }
 0x401   : > { %v1135_v62 = vpop.f32.mrb[8].mxu0 }
 0x402   : > { %v1142_v63 = vpack.c.bf16 %v1135_v62, %v1135_v62  ;;  %v1679_v0 = vpop.f32.mrb[9].mxu0 }
 0x403   : > { %v1138_v1 = vpop.f32.mrb[10].mxu0 }
 0x404   : > { %v1680_v2 = vpop.f32.mrb[11].mxu0  ;;  %1684 = vmatmul.mubr.msk.bf16.vlgmr.msra.gmra.mrb[8].mxu1 %vm1035_vm8, %v1142_v63 }
 0x405   : > { %1699 = vmatprep.mubr.msk.bf16.mxu1 (!%p1605_p8), %vm1812_vm10, %v1811_v19  ;;  %1696 = vmatpush3.bf16.msra.mxu1 (!%p1605_p8), %v1761_v31 }
 0x406   : > { %1697 = vmatprep.subr.bf16.mxu1 (!%p1605_p8), %v1811_v19 }
 0x409   : > { %1698 = vmatpush3.bf16.msra.mxu1 (!%p1605_p8), %v1762_v32 }
 0x4d4   : > { %1195 = sbr.rel (%p1605_p8) target bundleno = 2315 (0x90b), region = 108 }
 0x4d7   : > { %v1184_v4 = vpop.f32.mrb[8].mxu1 }
 0x4d8   : > { %v1190_v5 = vadd.f32 %v1184_v4, %v1141_v3  ;;  %v1685_v6 = vpop.f32.mrb[9].mxu1 }
 0x4d9   : > { %v1187_v7 = vpop.f32.mrb[10].mxu1 }
 0x4da   : > { %1191 = vst.msk [vmem:[#allocation2] sm:$0xff] %vm854_vm7, %v1190_v5  ;;  %v1686_v8 = vpop.f32.mrb[11].mxu1 }
 0x4e1   : > { %v1196_v9 = vld [vmem:[#allocation2] sm:$0xff] }
 0x4e2   : > { %v1204_v11 = vadd.f32 %v1606_v10, %v1196_v9 }
 0x4e4   : > { %v1207_v12 = vsel %vm854_vm7, %v1204_v11, 0.0 }
 0x4e5   : > { %1208 = vadd.xlane.f32.xlu0 %v1207_v12 }
 0x572   : > { %v1209_v13 = vpop.xlane.xlu0 %1208 }
 0x573   : > { %v1211_v14 = vmul.f32 0.03125, %v1209_v13 }
 0x575   : > { %v1212_v15 = vsub.f32 %v1204_v11, %v1211_v14 }
 0x577   : > { %v1213_v16 = vmul.f32 %v1212_v15, %v1212_v15 }
 0x579   : > { %v1214_v17 = vsel %vm854_vm7, %v1213_v16, 0.0 }
 0x57a   : > { %1215 = vadd.xlane.f32.xlu0 %v1214_v17 }
 0x607   : > { %v1216_v21 = vpop.xlane.xlu0 %1215 }
 0x608   : > { %v1217_v22 = vmul.f32 0.03125, %v1216_v21 }
 0x60a   : > { %v1218_v23 = vadd.f32 1e-05, %v1217_v22 }
 0x60c   : > { %1763 = vrsqrt.f32 %v1218_v23 }
 0x616   : > { %v1764_v24 = vpop.eup %1763 }
 0x617   : > { %v1220_v26 = vmul.f32 %v1764_v24, %v1212_v15 }
 0x619   : > { %v1227_v28 = vmul.f32 %v1607_v25, %v1220_v26 }
 0x61b   : > { %v1234_v29 = vadd.f32 %v1608_v27, %v1227_v28 }
 0x61d   : > { %v1235_v30 = vpack.c.bf16 %v1234_v29, %v1234_v29 }
 0x61f   : > { %1692 = vmatmul.mubr.msk.bf16.vlgmr.msra.gmra.mrb[0].mxu0 %vm854_vm7, %v1235_v30 }
 0x6f2   : > { %v1296_v34 = vpop.f32.mrb[0].mxu0 }
 0x6f3   : > { %v1297_v35 = vadd.f32 %v1609_v33, %v1296_v34  ;;  %v1693_v36 = vpop.f32.mrb[1].mxu0 }
 0x6f4   : > { %v1299_v37 = vpop.f32.mrb[2].mxu0 }
 0x6f5   : > { %v1302_v38 = vmax.f32 %v1297_v35, 0.0  ;;  %v1694_v39 = vpop.f32.mrb[3].mxu0 }
 0x6f7   : > { %v1303_v40 = vpack.c.bf16 %v1302_v38, %v1302_v38 }
 0x6f9   : > { %1700 = vmatmul.mubr.msk.bf16.vlgmr.msra.gmra.mrb[0].mxu1 %vm854_vm7, %v1303_v40 }
 0x7cc   : > { %v1364_v42 = vpop.f32.mrb[0].mxu1 }
 0x7cd   : > { %v1365_v43 = vadd.f32 %v1613_v41, %v1364_v42  ;;  %v1701_v44 = vpop.f32.mrb[1].mxu1 }
 0x7ce   : > { %v1367_v45 = vpop.f32.mrb[2].mxu1 }
 0x7cf   : > { %v1702_v46 = vpop.f32.mrb[3].mxu1  ;;  %v1372_v47 = vsel %vm854_vm7, %v1365_v43, 0.0 }
 0x7d0   : > { %1373 = vadd.xlane.f32.xlu1 %v1372_v47 }
 0x85d   : > { %v1374_v48 = vpop.xlane.xlu1 %1373 }
 0x85e   : > { %v1375_v49 = vmul.f32 0.03125, %v1374_v48 }
 0x860   : > { %v1376_v50 = vsub.f32 %v1365_v43, %v1375_v49 }
 0x862   : > { %v1377_v51 = vmul.f32 %v1376_v50, %v1376_v50 }
 0x864   : > { %v1378_v52 = vsel %vm854_vm7, %v1377_v51, 0.0 }
 0x865   : > { %1379 = vadd.xlane.f32.xlu1 %v1378_v52 }
 0x8f2   : > { %v1380_v53 = vpop.xlane.xlu1 %1379 }
 0x8f3   : > { %v1381_v54 = vmul.f32 0.03125, %v1380_v53 }
 0x8f5   : > { %v1382_v55 = vadd.f32 1e-05, %v1381_v54 }
 0x8f7   : > { %1765 = vrsqrt.f32 %v1382_v55 }
 0x901   : > { %v1766_v56 = vpop.eup %1765 }
 0x902   : > { %v1384_v58 = vmul.f32 %v1766_v56, %v1376_v50 }
 0x904   : > { %v1391_v60 = vmul.f32 %v1617_v57, %v1384_v58 }
 0x906   : > { %v1398_v61 = vadd.f32 %v1618_v59, %v1391_v60 }
 0x908   : > { %v1399_v62 = vadd.f32 %v1398_v61, %v1234_v29 }
 0x90a   : > { %1400 = vst.msk [vmem:[%s2008_s23] sm:$0xff] %vm854_vm7, %v1399_v62 }
 0x90b PF: > { %s2190_s30 = sld [smem:[#allocation7_spill]]  ;;  %s2191_s1 = sld [smem:[#allocation5_spill]] }
 0x90c   : > { %s2192_s22 = sld [smem:[#allocation6_spill]]  ;;  %s2193_s23 = sld [smem:[#allocation8_spill]] }
 0x90d   : > { %s2194_s24 = sld [smem:[#allocation9_spill]] }
 0x911   : > { %s30_s2 = sadd.s32 1, %s2190_s30  }
 0x912   : > { %p27_p9 = scmp.ge.s32.totalorder %s30_s2, 10  }
 0x914   :  { %29 = sbr.rel (!%p27_p9) target bundleno = 15 (0xf), region = 168 }

</bundles_post_ra>
